<compile_context>
chip_gen: v6e
topology: v6e:2x2x1
jax: 0.10.0
libtpu: 0.0.40
codegen_flags: <defaults>
</compile_context>

<pallas_src>
import jax
import jax.numpy as jnp
from jax import lax
from jax.experimental import pallas as pl
from jax.experimental.pallas import tpu as pltpu


def _round_up(x, m):
    return ((x + m - 1) // m) * m


def _padded_tile_bytes(rows, cols, itemsize):
    # VMEM tiles are laid out on (8,128) f32 / (16,128) bf16 vreg tiles; rounding
    # rows to 16 and lanes to 128 upper-bounds the padded footprint for both.
    return _round_up(max(rows, 1), 16) * _round_up(max(cols, 1), 128) * itemsize


def linear_kernel(x_ref, w_ref, b_ref, o_ref):
    # x_ref: (TM, K)   w_ref: (N, K)   b_ref: (1, N)   o_ref: (TM, N)
    # Contract K of x against K of w (native PyTorch nn.Linear weight layout,
    # no wrapper-side weight transpose); f32 accumulation on the MXU.
    acc = lax.dot_general(
        x_ref[...], w_ref[...],
        dimension_numbers=(((1,), (1,)), ((), ())),
        preferred_element_type=jnp.float32,
    )
    o_ref[...] = (acc + b_ref[...]).astype(o_ref.dtype)
    # TODO(synk): module forward() is linear-only; no sigmoid/softmax to fuse.


def _choose_tm(B, K, N, itemsize, vmem_tile_budget=20 * 1024 * 1024):
    """128-aligned row tile: MiB-scale, VMEM-budgeted, >=2 grid steps when cheap."""
    if B <= 256:
        return B  # tiny batch: whole batch in one step (full-dim block is exempt)
    # Padded bytes per 128 rows of (x tile + f32 out tile), double-buffered.
    per_128_rows = (_padded_tile_bytes(128, K, itemsize)
                    + _padded_tile_bytes(128, N, 4))
    tm_cap = max(128, (vmem_tile_budget // (2 * per_128_rows)) * 128)
    tm_cap = min(tm_cap, 8192)
    if B <= 2 * tm_cap:
        # At least two grid steps so both v7x TensorCores get work.
        return min(_round_up(pl.cdiv(B, 2), 128), tm_cap)
    return tm_cap


def logistic_regression_forward(x, weight, bias, *, tm=None, use_bf16=False):
    """x: (B, K); weight: (N, K) (PyTorch nn.Linear layout); bias: (N,).

    Returns (B, N) f32 = x @ weight.T + bias.
    """
    B, K = x.shape
    N = weight.shape[0]

    in_dtype = jnp.bfloat16 if use_bf16 else jnp.float32
    itemsize = jnp.dtype(in_dtype).itemsize

    if tm is None:
        tm = _choose_tm(B, K, N, itemsize)
    tm = min(tm, B)
    grid = (pl.cdiv(B, tm),)

    # Explicit VMEM budget (double-buffered x / out tiles + resident weight/bias),
    # with headroom; keeps the kernel portable to v7x's 64 MiB physical VMEM.
    vmem_est = (2 * _padded_tile_bytes(tm, K, itemsize)
                + 2 * _padded_tile_bytes(tm, N, 4)
                + _padded_tile_bytes(N, K, itemsize)
                + _padded_tile_bytes(1, N, 4))
    vmem_limit = int(min(max(32 * 1024 * 1024, 2 * vmem_est), 60 * 1024 * 1024))

    cost = pl.CostEstimate(
        flops=2 * B * K * N,
        transcendentals=0,
        bytes_accessed=B * K * itemsize + N * K * itemsize + B * N * 4,
    )

    xin = x.astype(in_dtype)
    win = weight.astype(in_dtype)
    b2d = bias.astype(jnp.float32).reshape(1, N)

    out = pl.pallas_call(
        linear_kernel,
        out_shape=jax.ShapeDtypeStruct((B, N), jnp.float32),
        grid_spec=pltpu.PrefetchScalarGridSpec(
            num_scalar_prefetch=0,
            grid=grid,
            in_specs=[
                pl.BlockSpec((tm, K), lambda i: (i, 0)),   # x row tile
                pl.BlockSpec((N, K), lambda i: (0, 0)),    # weight, resident (DMA once)
                pl.BlockSpec((1, N), lambda i: (0, 0)),    # bias, resident
            ],
            out_specs=pl.BlockSpec((tm, N), lambda i: (i, 0)),  # direct (B, N) write
        ),
        compiler_params=pltpu.CompilerParams(
            dimension_semantics=("parallel",),
            vmem_limit_bytes=vmem_limit,
        ),
        cost_estimate=cost,
    )(xin, win, b2d)
    return out


if __name__ == "__main__":
    # Small shapes consistent with the module: input_dim features -> output_dim classes.
    batch, input_dim, output_dim = 8, 32, 4

    key = jax.random.PRNGKey(0)
    kx, kw, kb = jax.random.split(key, 3)

    x = jax.random.normal(kx, (batch, input_dim), dtype=jnp.float32)
    # Deterministic init mimicking nn.Linear's uniform(-1/sqrt(K), 1/sqrt(K)).
    bound = 1.0 / (input_dim ** 0.5)
    weight = jax.random.uniform(kw, (output_dim, input_dim),
                                minval=-bound, maxval=bound, dtype=jnp.float32)
    bias = jax.random.uniform(kb, (output_dim,),
                              minval=-bound, maxval=bound, dtype=jnp.float32)

    fwd = jax.jit(logistic_regression_forward, static_argnames=("tm", "use_bf16"))

    out = jax.block_until_ready(fwd(x, weight, bias))
    ref = x @ weight.T + bias
    assert out.shape == (batch, output_dim)
    assert jnp.allclose(out, ref, atol=1e-5, rtol=1e-5)

    # Multi-block path: default tile selection gives grid >= 2 (v7x 2-TC split).
    batch2 = 1024
    x2 = jax.random.normal(jax.random.PRNGKey(1), (batch2, input_dim), dtype=jnp.float32)
    out2 = jax.block_until_ready(fwd(x2, weight, bias))
    ref2 = x2 @ weight.T + bias
    assert out2.shape == (batch2, output_dim)
    assert jnp.allclose(out2, ref2, atol=1e-5, rtol=1e-5)

    # Ragged last tile + explicit tile override.
    batch3 = 300
    x3 = jax.random.normal(jax.random.PRNGKey(2), (batch3, input_dim), dtype=jnp.float32)
    out3 = jax.block_until_ready(fwd(x3, weight, bias, tm=128))
    ref3 = x3 @ weight.T + bias
    assert out3.shape == (batch3, output_dim)
    assert jnp.allclose(out3, ref3, atol=1e-5, rtol=1e-5)

    # Optional bf16-input fast path (halves HBM read traffic; looser tolerance).
    out_bf16 = jax.block_until_ready(fwd(x2, weight, bias, use_bf16=True))
    assert jnp.allclose(out_bf16, ref2, atol=5e-2, rtol=5e-2)

    print("KERNEL_OK")
</pallas_src>

<mosaic_0001>
module attributes {stable_mosaic.version = 11 : i64} {
  func.func @linear_kernel(%arg0: i32, %arg1: memref<8x32xf32, #tpu.memory_space<vmem>>, %arg2: memref<4x32xf32, #tpu.memory_space<vmem>>, %arg3: memref<1x4xf32, #tpu.memory_space<vmem>>, %arg4: memref<8x4xf32, #tpu.memory_space<vmem>>) attributes {dimension_semantics = [#tpu.dimension_semantics<parallel>], iteration_bounds = array<i64: 1>, scalar_prefetch = 0 : i64, scratch_operands = 0 : i64, tpu.core_type = #tpu.core_type<tc>, window_params = [{transform_indices = @transform_0, window_bounds = array<i64: 8, 32>}, {pipeline_mode = #tpu.pipeline_mode<synchronous>, transform_indices = @transform_1, window_bounds = array<i64: 4, 32>}, {pipeline_mode = #tpu.pipeline_mode<synchronous>, transform_indices = @transform_2, window_bounds = array<i64: 1, 4>}, {transform_indices = @transform_3, window_bounds = array<i64: 8, 4>}]} {
    %c0 = arith.constant 0 : index
    %c0_0 = arith.constant 0 : index
    %0 = vector.load %arg1[%c0, %c0_0] : memref<8x32xf32, #tpu.memory_space<vmem>>, vector<8x32xf32>
    %c0_1 = arith.constant 0 : index
    %c0_2 = arith.constant 0 : index
    %1 = vector.load %arg2[%c0_1, %c0_2] : memref<4x32xf32, #tpu.memory_space<vmem>>, vector<4x32xf32>
    %cst = arith.constant dense<0.000000e+00> : vector<8x4xf32>
    %2 = tpu.matmul %0, %1, %cst {dimension_numbers = #tpu.dot_dimension_numbers<[1], [1], [0], [0], [0, 0, 1, 0], [], []>} : vector<8x32xf32>, vector<4x32xf32>, vector<8x4xf32> -> vector<8x4xf32>
    %c0_3 = arith.constant 0 : index
    %c0_4 = arith.constant 0 : index
    %3 = vector.load %arg3[%c0_3, %c0_4] : memref<1x4xf32, #tpu.memory_space<vmem>>, vector<1x4xf32>
    %4 = vector.broadcast %3 : vector<1x4xf32> to vector<8x4xf32>
    %5 = arith.addf %2, %4 : vector<8x4xf32>
    %c0_5 = arith.constant 0 : index
    %c0_6 = arith.constant 0 : index
    %6 = vector.load %arg4[%c0_5, %c0_6] : memref<8x4xf32, #tpu.memory_space<vmem>>, vector<8x4xf32>
    tpu.vector_store %arg4[%c0_5, %c0_6], %5 {strides = array<i32>} : memref<8x4xf32, #tpu.memory_space<vmem>>, vector<8x4xf32>,
    return
  }
  func.func @transform_0(%arg0: i32) -> (i32, i32) {
    %c0_i32 = arith.constant 0 : i32
    %c0_i32_0 = arith.constant 0 : i32
    return %arg0, %c0_i32 : i32, i32
  }
  func.func @transform_1(%arg0: i32) -> (i32, i32) {
    %c0_i32 = arith.constant 0 : i32
    %c0_i32_0 = arith.constant 0 : i32
    %c0_i32_1 = arith.constant 0 : i32
    return %c0_i32, %c0_i32_0 : i32, i32
  }
  func.func @transform_2(%arg0: i32) -> (i32, i32) {
    %c0_i32 = arith.constant 0 : i32
    %c0_i32_0 = arith.constant 0 : i32
    %c0_i32_1 = arith.constant 0 : i32
    return %c0_i32, %c0_i32_0 : i32, i32
  }
  func.func @transform_3(%arg0: i32) -> (i32, i32) {
    %c0_i32 = arith.constant 0 : i32
    %c0_i32_0 = arith.constant 0 : i32
    return %arg0, %c0_i32 : i32, i32
  }
}

</mosaic_0001>

<bundles_post_ra>
// kernel: logistic_regression_forward.1
= control target key start
LH: loop header
LB: loop body
LE: loop exit
PB: predicated region body
PF: predicated region fallthrough
CT: control target
= control target key end

     0   :  { %8 = vsyncpa [#allocation3], 0  ;;  %s226_s0 = inlined_call_operand.hbm [shape: f32[8,32], index: 0, kind: input, shape index: {}]   ;;  %s227_s1 = inlined_call_operand.hbm [shape: f32[4,32], index: 1, kind: input, shape index: {}]   ;;  %s228_s2 = inlined_call_operand.vmem [shape: f32[1,4], index: 2, kind: input, shape index: {}]   ;;  %s229_s3 = inlined_call_operand.vmem [shape: f32[8,4], index: 3, kind: output, shape index: {}]  }
   0x1   :  { %9 = vsyncpa [#allocation5], 0  ;;  %s190_s12 = smov [#allocation2]   ;;  %s191_s14 = smov [#allocation4]  }
   0x2   :  { %s16_s13 = sshll.u32 %s190_s12, 4  ;;  %s26_s15 = sshll.u32 %s191_s14, 4  ;;  %s17_s13 = int_to_ptr.vmem [resolvable:$true] %s16_s13  ;;  %s27_s15 = int_to_ptr.vmem [resolvable:$true] %s26_s15 }
   0x3   :  { %s154_s16 = scalar_lea.vmem %s17_s13, 128  ;;  %p159_p1 = scmp.lt.s32.totalorder %s17_s13, %s17_s13 }
   0x4   :  { %p155_p0 = scmp.ne.s32.totalorder %s17_s13, %s154_s16  ;;  %p160_p2 = scmp.lt.s32.totalorder %s154_s16, %s154_s16 }
   0x6   :  { %p161_p3 = por %p160_p2, %p159_p1 }
   0x8   :  { %p162_p4 = pnand %p161_p3, %p155_p0 }
   0xa   :  { %165 = shalt.err (!%p162_p4)
}
   0xb   :  { %19 = dma.hbm_to_vmem [thread:$0]  %s226_s0, 128, %s17_s13, [#allocation3]  }
   0xc   :  { %s174_s19 = scalar_lea.vmem %s27_s15, 64  ;;  %p179_p6 = scmp.lt.s32.totalorder %s27_s15, %s27_s15 }
   0xd   :  { %p175_p5 = scmp.ne.s32.totalorder %s27_s15, %s174_s19  ;;  %p180_p7 = scmp.lt.s32.totalorder %s174_s19, %s174_s19 }
   0xf   :  { %p181_p8 = por %p180_p7, %p179_p6 }
  0x11   :  { %p182_p9 = pnand %p181_p8, %p175_p5 }
  0x13   :  { %185 = shalt.err (!%p182_p9)
}
  0x14   :  { %29 = dma.hbm_to_vmem [thread:$0]  %s227_s1, 64, %s27_s15, [#allocation5]  }
  0x15   :  { %186 = dma.done.wait [#allocation3], 128  }
  0x16   :  { %187 = vsyncadd [#allocation3], 4294967168 }
  0x17   :  { %188 = dma.done.wait [#allocation5], 64  }
  0x18   :  { %189 = vsyncadd [#allocation5], 4294967232  ;;  %v192_v0 = vmov 0.0   ;;  %vm193_vm0 = vmmov 0   ;;  %vm47_vm1 = vcmask 261120   ;;  %v38_v2 = vld [vmem:[#allocation2] sm:$0xff] }
  0x19   :  { %137 = vmatprep.subr.mxu0 %v192_v0  ;;  %139 = vmatprep.mubr.msk.f32.mxu0 %vm193_vm0, %v192_v0  ;;  %v39_v1 = vld [vmem:[#allocation4] sm:$0xf]  ;;  %v132_v3 = vld [vmem:[%s228_s2] ss:$0 sm:$0xff]  ;;  %vm124_vm2 = vcmask 31744  }
  0x1a   :  { %138 = vmatpush3.xpose.msk.msra.mxu0 %vm47_vm1, %v39_v1 }
  0x1d   :  { %140 = vmatmul.mubr.msk.f32.vlgmr.msra.gmra.mxu0 %vm47_vm1, %v38_v2 }
  0xdd   :  { %v120_v4 = vpop.f32.mrf.mxu0 }
  0xde   :  { %v121_v5 = vadd.f32 %v132_v3, %v120_v4 }
  0xdf   :  { %v141_v6 = vpop.f32.mrf.mxu0 }
  0xe0   :  { %125 = vst.msk [vmem:[%s229_s3] sm:$0xff] %vm124_vm2, %v121_v5 }
  0xe1   :  { %130 = vsyncpa [#allocation3], 1 }
  0xe2   :  { %131 = vsyncpa [#allocation5], 1 }

</bundles_post_ra>
